<compile_context>
chip_gen: v7x
topology: tpu7x:2x2x1
jax: 0.10.0
libtpu: 0.0.40
codegen_flags: <defaults>
</compile_context>

<pallas_src>
import functools

import jax
import jax.numpy as jnp
from jax.experimental import pallas as pl
from jax.experimental.pallas import tpu as pltpu


def _round_up(x, m):
    return ((x + m - 1) // m) * m


def _pick_tiling(s, r, vmem_limit_bytes, max_tile=8192):
    """Lane-dense spatial tile and padded spatial extent.

    The f32 (r, tile) output block is double-buffered; keep 2 * r * tile * 4 bytes
    within ~half of the VMEM budget, and prefer tiles that are multiples of 128
    (unmasked full-lane stores).
    """
    cap = (vmem_limit_bytes // 2) // (2 * r * 4)
    cap = max(128, min(max_tile, cap - cap % 128))
    if s <= 128:
        return s, s                               # single full-extent block (allowed)
    n_tiles = -(-s // cap)                        # ceil
    tile = min(_round_up(-(-s // n_tiles), 128), cap)
    return tile, tile * n_tiles


def _input_stats_kernel(x_ref, sx_ref, g_ref):
    """Pass 1: per-instance input sufficient statistics.

    sx[c]    += sum_s x[c, s]
    g[c, c'] += sum_s x[c, s] * x[c', s]    (Cin x Cin Gram, f32 MXU accumulate)
    """
    @pl.when(pl.program_id(1) == 0)
    def _init():
        sx_ref[...] = jnp.zeros_like(sx_ref)
        g_ref[...] = jnp.zeros_like(g_ref)

    x = x_ref[0]                                              # (Cin, tile_s) bf16
    sx_ref[0] += jnp.sum(x.astype(jnp.float32), axis=-1, keepdims=True)
    g_ref[0] += jax.lax.dot_general(                          # x @ x^T, f32 accumulate
        x, x, dimension_numbers=(((1,), (1,)), ((), ())),
        preferred_element_type=jnp.float32)


def _convT_norm_lrelu_kernel(x_ref, wt_ref, mean_ref, rstd_ref, o_ref, *, slope):
    """Pass 2: y = W^T @ x_tile (f32 MXU accumulate), InstanceNorm, LeakyReLU."""
    y = jnp.dot(wt_ref[...], x_ref[0],
                preferred_element_type=jnp.float32)           # (Cout*8, tile_s) f32
    yn = (y - mean_ref[0]) * rstd_ref[0]
    o_ref[0] = jnp.where(yn >= 0, yn, slope * yn)


def upsample_block(x, w, *, eps=1e-5, negative_slope=0.01,
                   vmem_limit_bytes=32 * 1024 * 1024):
    """x: (N, Cin, D, H, W) f32; w: (Cin, Cout, 2, 2, 2) f32 (PyTorch ConvTranspose3d layout)."""
    N, Cin, D, H, W = x.shape
    Cin_w, Cout, kD, kH, kW = w.shape
    assert Cin_w == Cin and kD == 2 and kH == 2 and kW == 2

    S = D * H * W
    R = Cout * 8                                  # output rows per voxel: (cout, kd, kh, kw)
    tile_s, S_pad = _pick_tiling(S, R, vmem_limit_bytes)
    grid = (N, S_pad // tile_s)

    # bf16 matmul operands; no channels-last XLA transpose of the input volume.
    x3 = x.reshape(N, Cin, S).astype(jnp.bfloat16)
    if S_pad != S:
        x3 = jnp.pad(x3, ((0, 0), (0, 0), (0, S_pad - S)))    # zero pad: stats unaffected
    wt = jnp.transpose(w.reshape(Cin, R), (1, 0)).astype(jnp.bfloat16)    # (Cout*8, Cin)

    x_spec = pl.BlockSpec((1, Cin, tile_s), lambda n, s: (n, 0, s))
    w_spec = pl.BlockSpec((R, Cin), lambda n, s: (0, 0))
    stat_spec = pl.BlockSpec((1, R, 1), lambda n, s: (n, 0, 0))

    # ---- pass 1: tiny per-instance input statistics (channel sums + Gram) ----
    sx, g = pl.pallas_call(
        _input_stats_kernel,
        grid=grid,
        in_specs=[x_spec],
        out_specs=(pl.BlockSpec((1, Cin, 1), lambda n, s: (n, 0, 0)),
                   pl.BlockSpec((1, Cin, Cin), lambda n, s: (n, 0, 0))),
        out_shape=(jax.ShapeDtypeStruct((N, Cin, 1), jnp.float32),
                   jax.ShapeDtypeStruct((N, Cin, Cin), jnp.float32)),
        compiler_params=pltpu.CompilerParams(
            dimension_semantics=("parallel", "arbitrary"),
            vmem_limit_bytes=vmem_limit_bytes),
    )(x3)

    # Closed-form per-(instance, cout) mean / rstd of the conv output from the input
    # stats (conv is linear).  O(N*Cout*Cin^2) flops in plain XLA, all in f32.
    a = wt.astype(jnp.float32).reshape(Cout, 8, Cin)          # bf16-rounded weights
    s1 = jnp.einsum('okc,nc->no', a, sx[..., 0])              # sum over all 8*S outputs
    s2 = jnp.einsum('okc,okd,ncd->no', a, a, g)               # sum of squares
    cnt = jnp.float32(8 * S)
    mean_c = s1 / cnt
    var_c = jnp.maximum(s2 / cnt - mean_c * mean_c, 0.0)      # biased var (InstanceNorm3d)
    rstd_c = jax.lax.rsqrt(var_c + eps)
    mean_b = jnp.broadcast_to(mean_c[:, :, None], (N, Cout, 8)).reshape(N, R, 1)
    rstd_b = jnp.broadcast_to(rstd_c[:, :, None], (N, Cout, 8)).reshape(N, R, 1)

    # ---- pass 2: fused matmul + InstanceNorm + LeakyReLU, lane-dense f32 output ----
    y = pl.pallas_call(
        functools.partial(_convT_norm_lrelu_kernel, slope=negative_slope),
        grid=grid,
        in_specs=[x_spec, w_spec, stat_spec, stat_spec],
        out_specs=pl.BlockSpec((1, R, tile_s), lambda n, s: (n, 0, s)),
        out_shape=jax.ShapeDtypeStruct((N, R, S_pad), jnp.float32),
        compiler_params=pltpu.CompilerParams(
            dimension_semantics=("parallel", "parallel"),
            vmem_limit_bytes=vmem_limit_bytes),
    )(x3, wt, mean_b, rstd_b)

    # ---- scatter the 2x2x2 taps into the upsampled volume (pure layout glue) ----
    # y[n, cout*8 + kd*4 + kh*2 + kw, d*H*W + h*W + w] -> out[n, cout, 2d+kd, 2h+kh, 2w+kw]
    # TODO(synk): fold this scatter into pass 2's output (in-VMEM relayout) to save the
    # final full-volume HBM round trip; kept as one XLA transpose for lowering safety.
    if S_pad != S:
        y = y[:, :, :S]
    z = y.reshape(N, Cout, 2, 2, 2, D, H, W)
    z = jnp.transpose(z, (0, 1, 5, 2, 6, 3, 7, 4))            # (N,Cout,D,kd,H,kh,W,kw)
    return z.reshape(N, Cout, 2 * D, 2 * H, 2 * W)


def _upsample_block_ref(x, w, *, eps=1e-5, negative_slope=0.01):
    """Pure-JAX reference of the PyTorch module forward."""
    N, Cin, D, H, W = x.shape
    Cout = w.shape[1]
    y = jnp.einsum('ncdhw,coijk->nodihjwk', x, w)
    y = y.reshape(N, Cout, 2 * D, 2 * H, 2 * W)
    m = jnp.mean(y, axis=(2, 3, 4), keepdims=True)
    v = jnp.mean((y - m) ** 2, axis=(2, 3, 4), keepdims=True)
    yn = (y - m) * jax.lax.rsqrt(v + eps)
    return jnp.where(yn >= 0, yn, negative_slope * yn)


if __name__ == "__main__":
    def check(n, cin, cout, d, h, w_sz, key, vmem_limit_bytes=32 * 1024 * 1024):
        kx, kw = jax.random.split(key)
        x = jax.random.normal(kx, (n, cin, d, h, w_sz), dtype=jnp.float32)
        # ConvTranspose3d weight layout: (in_dim, out_dim, 2, 2, 2), no bias
        w = 0.1 * jax.random.normal(kw, (cin, cout, 2, 2, 2), dtype=jnp.float32)

        fn = jax.jit(functools.partial(upsample_block, vmem_limit_bytes=vmem_limit_bytes))
        out = fn(x, w)
        jax.block_until_ready(out)
        assert out.shape == (n, cout, 2 * d, 2 * h, 2 * w_sz)

        # correctness check against pure-JAX reference (same bf16-rounded matmul inputs)
        x_q = x.astype(jnp.bfloat16).astype(jnp.float32)
        w_q = w.astype(jnp.bfloat16).astype(jnp.float32)
        ref = _upsample_block_ref(x_q, w_q)
        err = float(jnp.max(jnp.abs(out - ref)))
        assert err < 1e-2, f"max abs error too large: {err}"

    k1, k2 = jax.random.split(jax.random.PRNGKey(0))
    # small shapes consistent with the module: in_dim=4, out_dim=8
    check(2, 4, 8, 4, 4, 4, k1)
    # exercise spatial padding (S=1056 -> 1280) and multi-tile accumulation (2 s-tiles)
    check(2, 4, 8, 12, 11, 8, k2, vmem_limit_bytes=1 << 20)

    print("KERNEL_OK")
</pallas_src>

<mosaic_0001>
module attributes {stable_mosaic.version = 11 : i64} {
  func.func @_input_stats_kernel(%arg0: i32, %arg1: i32, %arg2: memref<1x4x64xbf16, #tpu.memory_space<vmem>>, %arg3: memref<1x4x1xf32, #tpu.memory_space<vmem>>, %arg4: memref<1x4x4xf32, #tpu.memory_space<vmem>>) attributes {dimension_semantics = [#tpu.dimension_semantics<parallel>, #tpu.dimension_semantics<arbitrary>], iteration_bounds = array<i64: 2, 1>, scalar_prefetch = 0 : i64, scratch_operands = 0 : i64, tpu.core_type = #tpu.core_type<tc>, window_params = [{transform_indices = @transform_0, window_bounds = array<i64: 1, 4, 64>}, {transform_indices = @transform_1, window_bounds = array<i64: 1, 4, 1>}, {transform_indices = @transform_2, window_bounds = array<i64: 1, 4, 4>}]} {
    %c0_i32 = arith.constant 0 : i32
    %0 = arith.cmpi eq, %arg1, %c0_i32 : i32
    %1 = arith.extui %0 : i1 to i32
    %c0_i32_0 = arith.constant 0 : i32
    %2 = arith.cmpi ne, %1, %c0_i32_0 : i32
    scf.if %2 {
      %cst_16 = arith.constant 0.000000e+00 : f32
      %21 = vector.broadcast %cst_16 : f32 to vector<1x4x1xf32>
      %c0_17 = arith.constant 0 : index
      %c0_18 = arith.constant 0 : index
      %c0_19 = arith.constant 0 : index
      %22 = vector.load %arg3[%c0_17, %c0_18, %c0_19] : memref<1x4x1xf32, #tpu.memory_space<vmem>>, vector<1x4x1xf32>
      tpu.vector_store %arg3[%c0_17, %c0_18, %c0_19], %21 {strides = array<i32>} : memref<1x4x1xf32, #tpu.memory_space<vmem>>, vector<1x4x1xf32>,
      %cst_20 = arith.constant 0.000000e+00 : f32
      %23 = vector.broadcast %cst_20 : f32 to vector<1x4x4xf32>
      %c0_21 = arith.constant 0 : index
      %c0_22 = arith.constant 0 : index
      %c0_23 = arith.constant 0 : index
      %24 = vector.load %arg4[%c0_21, %c0_22, %c0_23] : memref<1x4x4xf32, #tpu.memory_space<vmem>>, vector<1x4x4xf32>
      tpu.vector_store %arg4[%c0_21, %c0_22, %c0_23], %23 {strides = array<i32>} : memref<1x4x4xf32, #tpu.memory_space<vmem>>, vector<1x4x4xf32>,
    } else {
    }
    %c0 = arith.constant 0 : index
    %c0_1 = arith.constant 0 : index
    %c0_2 = arith.constant 0 : index
    %3 = vector.load %arg2[%c0, %c0_1, %c0_2] : memref<1x4x64xbf16, #tpu.memory_space<vmem>>, vector<1x4x64xbf16>
    %4 = vector.shape_cast %3 : vector<1x4x64xbf16> to vector<4x64xbf16>
    %c0_3 = arith.constant 0 : index
    %c0_4 = arith.constant 0 : index
    %c0_5 = arith.constant 0 : index
    %5 = vector.load %arg3[%c0_3, %c0_4, %c0_5] : memref<1x4x1xf32, #tpu.memory_space<vmem>>, vector<1x4x1xf32>
    %6 = vector.shape_cast %5 : vector<1x4x1xf32> to vector<4x1xf32>
    %7 = arith.extf %4 : vector<4x64xbf16> to vector<4x64xf32>
    %cst = arith.constant dense<0.000000e+00> : vector<4xf32>
    %8 = vector.multi_reduction <add>, %7, %cst [1] : vector<4x64xf32> to vector<4xf32>
    %9 = vector.shape_cast %8 : vector<4xf32> to vector<4x1xf32>
    %10 = arith.addf %6, %9 : vector<4x1xf32>
    %c0_6 = arith.constant 0 : index
    %c0_7 = arith.constant 0 : index
    %c0_8 = arith.constant 0 : index
    %11 = vector.load %arg3[%c0_6, %c0_7, %c0_8] : memref<1x4x1xf32, #tpu.memory_space<vmem>>, vector<1x4x1xf32>
    %12 = vector.shape_cast %11 : vector<1x4x1xf32> to vector<4x1xf32>
    %13 = vector.shape_cast %10 : vector<4x1xf32> to vector<1x4x1xf32>
    tpu.vector_store %arg3[%c0_6, %c0_7, %c0_8], %13 {strides = array<i32>} : memref<1x4x1xf32, #tpu.memory_space<vmem>>, vector<1x4x1xf32>,
    %c0_9 = arith.constant 0 : index
    %c0_10 = arith.constant 0 : index
    %c0_11 = arith.constant 0 : index
    %14 = vector.load %arg4[%c0_9, %c0_10, %c0_11] : memref<1x4x4xf32, #tpu.memory_space<vmem>>, vector<1x4x4xf32>
    %15 = vector.shape_cast %14 : vector<1x4x4xf32> to vector<4x4xf32>
    %cst_12 = arith.constant dense<0.000000e+00> : vector<4x4xf32>
    %16 = tpu.matmul %4, %4, %cst_12 {dimension_numbers = #tpu.dot_dimension_numbers<[1], [1], [0], [0], [0, 0, 1, 0], [], []>} : vector<4x64xbf16>, vector<4x64xbf16>, vector<4x4xf32> -> vector<4x4xf32>
    %17 = arith.addf %15, %16 : vector<4x4xf32>
    %c0_13 = arith.constant 0 : index
    %c0_14 = arith.constant 0 : index
    %c0_15 = arith.constant 0 : index
    %18 = vector.load %arg4[%c0_13, %c0_14, %c0_15] : memref<1x4x4xf32, #tpu.memory_space<vmem>>, vector<1x4x4xf32>
    %19 = vector.shape_cast %18 : vector<1x4x4xf32> to vector<4x4xf32>
    %20 = vector.shape_cast %17 : vector<4x4xf32> to vector<1x4x4xf32>
    tpu.vector_store %arg4[%c0_13, %c0_14, %c0_15], %20 {strides = array<i32>} : memref<1x4x4xf32, #tpu.memory_space<vmem>>, vector<1x4x4xf32>,
    return
  }
  func.func @transform_0(%arg0: i32, %arg1: i32) -> (i32, i32, i32) {
    %c0_i32 = arith.constant 0 : i32
    %c0_i32_0 = arith.constant 0 : i32
    return %arg0, %c0_i32, %arg1 : i32, i32, i32
  }
  func.func @transform_1(%arg0: i32, %arg1: i32) -> (i32, i32, i32) {
    %c0_i32 = arith.constant 0 : i32
    %c0_i32_0 = arith.constant 0 : i32
    %c0_i32_1 = arith.constant 0 : i32
    return %arg0, %c0_i32, %c0_i32_0 : i32, i32, i32
  }
  func.func @transform_2(%arg0: i32, %arg1: i32) -> (i32, i32, i32) {
    %c0_i32 = arith.constant 0 : i32
    %c0_i32_0 = arith.constant 0 : i32
    %c0_i32_1 = arith.constant 0 : i32
    return %arg0, %c0_i32, %c0_i32_0 : i32, i32, i32
  }
}

module attributes {stable_mosaic.version = 11 : i64} {
  func.func @_convT_norm_lrelu_kernel(%arg0: i32, %arg1: i32, %arg2: memref<1x4x64xbf16, #tpu.memory_space<vmem>>, %arg3: memref<64x4xbf16, #tpu.memory_space<vmem>>, %arg4: memref<1x64x1xf32, #tpu.memory_space<vmem>>, %arg5: memref<1x64x1xf32, #tpu.memory_space<vmem>>, %arg6: memref<1x64x64xf32, #tpu.memory_space<vmem>>) attributes {dimension_semantics = [#tpu.dimension_semantics<parallel>, #tpu.dimension_semantics<parallel>], iteration_bounds = array<i64: 2, 1>, scalar_prefetch = 0 : i64, scratch_operands = 0 : i64, tpu.core_type = #tpu.core_type<tc>, window_params = [{transform_indices = @transform_0, window_bounds = array<i64: 1, 4, 64>}, {pipeline_mode = #tpu.pipeline_mode<synchronous>, transform_indices = @transform_1, window_bounds = array<i64: 64, 4>}, {transform_indices = @transform_2, window_bounds = array<i64: 1, 64, 1>}, {transform_indices = @transform_3, window_bounds = array<i64: 1, 64, 1>}, {transform_indices = @transform_4, window_bounds = array<i64: 1, 64, 64>}]} {
    %c0 = arith.constant 0 : index
    %c0_0 = arith.constant 0 : index
    %0 = vector.load %arg3[%c0, %c0_0] : memref<64x4xbf16, #tpu.memory_space<vmem>>, vector<64x4xbf16>
    %c0_1 = arith.constant 0 : index
    %c0_2 = arith.constant 0 : index
    %c0_3 = arith.constant 0 : index
    %1 = vector.load %arg2[%c0_1, %c0_2, %c0_3] : memref<1x4x64xbf16, #tpu.memory_space<vmem>>, vector<1x4x64xbf16>
    %2 = vector.shape_cast %1 : vector<1x4x64xbf16> to vector<4x64xbf16>
    %cst = arith.constant dense<0.000000e+00> : vector<64x64xf32>
    %3 = tpu.matmul %0, %2, %cst {dimension_numbers = #tpu.dot_dimension_numbers<[1], [0], [0], [1], [0, 0, 1, 1], [], []>} : vector<64x4xbf16>, vector<4x64xbf16>, vector<64x64xf32> -> vector<64x64xf32>
    %c0_4 = arith.constant 0 : index
    %c0_5 = arith.constant 0 : index
    %c0_6 = arith.constant 0 : index
    %4 = vector.load %arg4[%c0_4, %c0_5, %c0_6] : memref<1x64x1xf32, #tpu.memory_space<vmem>>, vector<1x64x1xf32>
    %5 = vector.shape_cast %4 : vector<1x64x1xf32> to vector<64x1xf32>
    %6 = vector.broadcast %5 : vector<64x1xf32> to vector<64x64xf32>
    %7 = arith.subf %3, %6 : vector<64x64xf32>
    %c0_7 = arith.constant 0 : index
    %c0_8 = arith.constant 0 : index
    %c0_9 = arith.constant 0 : index
    %8 = vector.load %arg5[%c0_7, %c0_8, %c0_9] : memref<1x64x1xf32, #tpu.memory_space<vmem>>, vector<1x64x1xf32>
    %9 = vector.shape_cast %8 : vector<1x64x1xf32> to vector<64x1xf32>
    %10 = vector.broadcast %9 : vector<64x1xf32> to vector<64x64xf32>
    %11 = arith.mulf %7, %10 : vector<64x64xf32>
    %cst_10 = arith.constant 0.000000e+00 : f32
    %12 = vector.broadcast %cst_10 : f32 to vector<64x64xf32>
    %13 = arith.cmpf oge, %11, %12 : vector<64x64xf32>
    %cst_11 = arith.constant 0.00999999977 : f32
    %14 = vector.broadcast %cst_11 : f32 to vector<64x64xf32>
    %15 = arith.mulf %14, %11 : vector<64x64xf32>
    %16 = arith.select %13, %11, %15 : vector<64x64xi1>, vector<64x64xf32>
    %c0_12 = arith.constant 0 : index
    %c0_13 = arith.constant 0 : index
    %c0_14 = arith.constant 0 : index
    %17 = vector.load %arg6[%c0_12, %c0_13, %c0_14] : memref<1x64x64xf32, #tpu.memory_space<vmem>>, vector<1x64x64xf32>
    %18 = vector.shape_cast %17 : vector<1x64x64xf32> to vector<64x64xf32>
    %19 = vector.shape_cast %16 : vector<64x64xf32> to vector<1x64x64xf32>
    tpu.vector_store %arg6[%c0_12, %c0_13, %c0_14], %19 {strides = array<i32>} : memref<1x64x64xf32, #tpu.memory_space<vmem>>, vector<1x64x64xf32>,
    return
  }
  func.func @transform_0(%arg0: i32, %arg1: i32) -> (i32, i32, i32) {
    %c0_i32 = arith.constant 0 : i32
    %c0_i32_0 = arith.constant 0 : i32
    return %arg0, %c0_i32, %arg1 : i32, i32, i32
  }
  func.func @transform_1(%arg0: i32, %arg1: i32) -> (i32, i32) {
    %c0_i32 = arith.constant 0 : i32
    %c0_i32_0 = arith.constant 0 : i32
    %c0_i32_1 = arith.constant 0 : i32
    return %c0_i32, %c0_i32_0 : i32, i32
  }
  func.func @transform_2(%arg0: i32, %arg1: i32) -> (i32, i32, i32) {
    %c0_i32 = arith.constant 0 : i32
    %c0_i32_0 = arith.constant 0 : i32
    %c0_i32_1 = arith.constant 0 : i32
    return %arg0, %c0_i32, %c0_i32_0 : i32, i32, i32
  }
  func.func @transform_3(%arg0: i32, %arg1: i32) -> (i32, i32, i32) {
    %c0_i32 = arith.constant 0 : i32
    %c0_i32_0 = arith.constant 0 : i32
    %c0_i32_1 = arith.constant 0 : i32
    return %arg0, %c0_i32, %c0_i32_0 : i32, i32, i32
  }
  func.func @transform_4(%arg0: i32, %arg1: i32) -> (i32, i32, i32) {
    %c0_i32 = arith.constant 0 : i32
    %c0_i32_0 = arith.constant 0 : i32
    return %arg0, %c0_i32, %arg1 : i32, i32, i32
  }
}

</mosaic_0001>

<bundles_post_ra>
// kernel: upsample_block.2
= control target key start
LH: loop header
LB: loop body
LE: loop exit
PB: predicated region body
PF: predicated region fallthrough
CT: control target
= control target key end

     0   :  { %s421_s9 = smov 0   ;;  %s423_s10 = smov 0   ;;  %s459_s0 = inlined_call_operand.vmem [shape: bf16[2,4,64], index: 0, kind: input, shape index: {}]   ;;  %s460_s1 = inlined_call_operand.vmem [shape: f32[2,4,1], index: 1, kind: output, shape index: {0}]   ;;  %s461_s2 = inlined_call_operand.vmem [shape: f32[2,4,4], index: 2, kind: output, shape index: {1}]  }
   0x1   :  { %s425_s11 = smov 0  }
   0x2 LB: > { %s25_s12 = sadd.s32 1, %s398_s10  ;;  %p339_p0 = scmp.ge.s32.totalorder %s402_s11, 1  ;;  %s402_s11 = sphi %s425_s11, %s13_s11   ;;  %s398_s10 = sphi %s423_s10, %s463_s10   ;;  %s394_s9 = sphi %s421_s9, %s462_s9  }
   0x3   : > { %p27_p1 = scmp.ge.s32.totalorder %s25_s12, 2  ;;  %p131_p2 = scmp.lt.s32.totalorder %s402_s11, 3 }
   0x5   : > { %s465_s12 = smov (%p27_p1, %s25_s12), 0  ;;  %p132_p3 = pnand %p339_p0, %p131_p2 }
   0x6   : > { %p158_p4 = scmp.lt.s32.totalorder (!%p132_p3), %s394_s9, 1  ;;  %v404_v0 = vmov (!%p132_p3), 0.0   ;;  %vm405_vm0 = vmmov (!%p132_p3), 0   ;;  %vm178_vm1 = vcmask (!%p132_p3), 3072   ;;  %vm193_vm2 = vcmask (!%p132_p3), 523264  }
   0x7   : > { %135 = sbr.rel (%p132_p3) target bundleno = 241 (0xf1), region = 24  ;;  %348 = vmatprep.subr.bf16.mxu0 (!%p132_p3), %v404_v0  ;;  %350 = vmatprep.mubr.msk.bf16.mxu0 (!%p132_p3), %vm405_vm0, %v404_v0  ;;  %vm185_vm3 = vcmask (!%p132_p3), 519168   ;;  %vm180_vm4 = vcmask (!%p132_p3), 27648  }
   0xe   : > { %s467_s9 = smov (!%p158_p4, %s394_s9), 1 }
   0xf   : > { %s340_s13 = sshll.u32 %s467_s9, 1  ;;  %s341_s14 = sshll.u32 %s467_s9, 2 }
  0x10   : > { %s164_s17 = scalar_lea.vmem %s459_s0, %s340_s13  ;;  %s168_s20 = scalar_lea.vmem %s460_s1, %s341_s14 }
  0x11   : > { %v182_v1 = vld [vmem:[%s164_s17] sm:$0x3]  ;;  %179 = vst.msk [vmem:[%s168_s20] sm:$0xf] %vm178_vm1, %v404_v0  ;;  %s172_s23 = scalar_lea.vmem %s461_s2, %s341_s14 }
  0x12   : > { %v195_v2 = vsel %vm193_vm2, %v182_v1, 0  ;;  %v184_v3 = vunpack.c.l.bf16 %v182_v1  ;;  %181 = vst.msk [vmem:[%s172_s23] sm:$0xf] %vm180_vm4, %v404_v0 }
  0x13   : > { %349 = vmatpush3.bf16.xpose.msra.mxu0 %v195_v2 }
  0x14   : > { %v186_v4 = vsel %vm185_vm3, %v184_v3, 0.0 }
  0x15   : > { %187 = vadd.xlane.f32.xlu0 %v186_v4 }
  0x18   : > { %v183_v5 = vld [vmem:[%s168_s20] sm:$0xf] }
  0x19   : > { %v192_v8 = vld [vmem:[%s172_s23] sm:$0xf] }
  0x1a   : > { %351 = vmatmul.mubr.msk.bf16.vlgmr.msra.gmra.mrb[0].mxu0 %vm193_vm2, %v182_v1 }
  0xa2   : > { %v188_v6 = vpop.xlane.xlu0 %187 }
  0xa3   : > { %v189_v7 = vadd.f32 %v188_v6, %v183_v5 }
  0xa5   : > { %191 = vst.msk [vmem:[%s168_s20] sm:$0xf] %vm178_vm1, %v189_v7 }
  0xed   : > { %v231_v9 = vpop.f32.mrb[0].mxu0 }
  0xee   : > { %v237_v10 = vadd.f32 %v231_v9, %v192_v8  ;;  %v352_v11 = vpop.f32.mrb[1].mxu0 }
  0xef   : > { %v234_v12 = vpop.f32.mrb[2].mxu0 }
  0xf0   : > { %239 = vst.msk [vmem:[%s172_s23] sm:$0xf] %vm180_vm4, %v237_v10  ;;  %v353_v13 = vpop.f32.mrb[3].mxu0 }
  0xf1 PF: > { %s13_s11 = sadd.s32 1, %s402_s11   ;;  %s462_s9 = smov %s398_s10 }
  0xf2   : > { %p10_p5 = scmp.ge.s32.totalorder %s13_s11, 4   ;;  %s463_s10 = smov %s465_s12 }
  0xf4   :  { %12 = sbr.rel (!%p10_p5) target bundleno = 2 (0x2), region = 70 }

// kernel: upsample_block.3
= control target key start
LH: loop header
LB: loop body
LE: loop exit
PB: predicated region body
PF: predicated region fallthrough
CT: control target
= control target key end

     0   :  { %s752_s15 = smov 0   ;;  %s754_s16 = smov 0   ;;  %s830_s0 = inlined_call_operand.vmem [shape: bf16[2,4,64], index: 0, kind: input, shape index: {}]   ;;  %s831_s1 = inlined_call_operand.vmem [shape: bf16[64,4], index: 1, kind: input, shape index: {}]   ;;  %s832_s2 = inlined_call_operand.vmem [shape: f32[2,64,1], index: 2, kind: input, shape index: {}]   ;;  %s833_s3 = inlined_call_operand.vmem [shape: f32[2,64,1], index: 3, kind: input, shape index: {}]   ;;  %s834_s4 = inlined_call_operand.vmem [shape: f32[2,64,64], index: 4, kind: output, shape index: {}]  }
   0x1   :  { %s756_s17 = smov 0  }
   0x2 LB: > { %s26_s18 = sadd.s32 1, %s720_s16  ;;  %p631_p0 = scmp.ge.s32.totalorder %s724_s17, 1  ;;  %s724_s17 = sphi %s756_s17, %s14_s17   ;;  %s720_s16 = sphi %s754_s16, %s836_s16   ;;  %s716_s15 = sphi %s752_s15, %s835_s15  }
   0x3   : > { %p28_p1 = scmp.ge.s32.totalorder %s26_s18, 2  ;;  %p200_p2 = scmp.lt.s32.totalorder %s724_s17, 3 }
   0x5   : > { %s838_s18 = smov (%p28_p1, %s26_s18), 0  ;;  %p201_p3 = pnand %p631_p0, %p200_p2 }
   0x6   : > { %p241_p4 = scmp.lt.s32.totalorder (!%p201_p3), %s716_s15, 1  ;;  %v698_v0 = vld [vmem:[%s831_s1] sm:$0xff] (!%p201_p3)   ;;  %vm296_vm0 = vcmask (!%p201_p3), 31744   ;;  %v699_v1 = vld [vmem:[%s831_s1 + $0x10] sm:$0xff] (!%p201_p3)   ;;  %vm309_vm1 = vcmask (!%p201_p3), 1041408   ;;  %v726_v2 = vmov (!%p201_p3), 0  }
   0x7   : > { %204 = sbr.rel (%p201_p3) target bundleno = 248 (0xf8), region = 36  ;;  %659 = vmatprep.mubr.msk.bf16.mxu0 (!%p201_p3), %vm296_vm0, %v698_v0  ;;  %663 = vmatprep.mubr.msk.bf16.mxu1 (!%p201_p3), %vm296_vm0, %v699_v1  ;;  %v700_v7 = vld [vmem:[%s831_s1 + $0x8] sm:$0xff] (!%p201_p3)   ;;  %v701_v8 = vld [vmem:[%s831_s1 + $0x18] sm:$0xff] (!%p201_p3)   ;;  %vm514_vm2 = vcmask (!%p201_p3), 523264  }
   0x8   : > { %697 = vset.pattern.permute.xlu1 (!%p201_p3), %v726_v2  ;;  %696 = vset.pattern.permute.xlu0 (!%p201_p3), %v726_v2 }
   0xe   : > { %s840_s15 = smov (!%p241_p4, %s716_s15), 1 }
   0xf   : > { %s632_s23 = sshll.u32 %s840_s15, 1  ;;  %s777_s24 = sshll.u32 %s840_s15, 6 }
  0x10   : > { %s247_s27 = scalar_lea.vmem %s830_s0, %s632_s23  ;;  %s252_s30 = scalar_lea.vmem %s832_s2, %s777_s24 }
  0x11   : > { %v275_v3 = vld [vmem:[%s247_s27] sm:$0x3]  ;;  %v380_v4 = vld [vmem:[%s252_s30 + $0x10] sm:$0xff]  ;;  %v381_v9 = vld [vmem:[%s252_s30 + $0x18] sm:$0xff]  ;;  %s257_s11 = scalar_lea.vmem %s833_s3, %s777_s24  ;;  %s803_s14 = scalar_lea.vmem %s834_s4, %s777_s24 }
  0x12   : > { %v378_v5 = vld [vmem:[%s252_s30] sm:$0xff]  ;;  %669 = vmatprep.subr.msk.bf16.mxu0 %vm309_vm1, %v275_v3  ;;  %670 = vmatprep.subr.msk.bf16.mxu1 %vm309_vm1, %v275_v3  ;;  %v311_v6 = vsel %vm309_vm1, %v275_v3, 0  ;;  %v379_v10 = vld [vmem:[%s252_s30 + $0x8] sm:$0xff]  ;;  %v385_v13 = vld [vmem:[%s252_s30 + $0x38] sm:$0xff] }
  0x13   : > { %658 = vmatpush3.bf16.msra.mxu0 %v311_v6  ;;  %668 = vmatpush3.bf16.msra.mxu1 %v311_v6  ;;  %v383_v11 = vld [vmem:[%s252_s30 + $0x28] sm:$0xff]  ;;  %v382_v12 = vld [vmem:[%s252_s30 + $0x20] sm:$0xff]  ;;  %v384_v14 = vld [vmem:[%s252_s30 + $0x30] sm:$0xff] }
  0x14   : > { %398 = vperm.xlu1 %697, %v380_v4   ;;  %388 = vperm.xlu0 %696, %v378_v5   ;;  %v435_v15 = vld [vmem:[%s257_s11 + $0x8] sm:$0xff]  ;;  %v434_v16 = vld [vmem:[%s257_s11] sm:$0xff]  ;;  %v437_v17 = vld [vmem:[%s257_s11 + $0x18] sm:$0xff] }
  0x15   : > { %v436_v18 = vld [vmem:[%s257_s11 + $0x10] sm:$0xff]  ;;  %v439_v19 = vld [vmem:[%s257_s11 + $0x28] sm:$0xff]  ;;  %v438_v20 = vld [vmem:[%s257_s11 + $0x20] sm:$0xff] }
  0x16   : > { %660 = vmatmul.mubr.msk.bf16.vlgmr.msra.gmra.mrb[0].mxu0 %vm296_vm0, %v700_v7  ;;  %664 = vmatmul.mubr.msk.bf16.vlgmr.msra.gmra.mrb[0].mxu1 %vm296_vm0, %v701_v8  ;;  %v441_v21 = vld [vmem:[%s257_s11 + $0x38] sm:$0xff]  ;;  %v440_v22 = vld [vmem:[%s257_s11 + $0x30] sm:$0xff] }
  0x18   : > { %403 = vperm.xlu1 %697, %v381_v9   ;;  %393 = vperm.xlu0 %696, %v379_v10  }
  0x1c   : > { %413 = vperm.xlu1 %697, %v383_v11   ;;  %408 = vperm.xlu0 %696, %v382_v12  }
  0x20   : > { %423 = vperm.xlu1 %697, %v385_v13   ;;  %418 = vperm.xlu0 %696, %v384_v14  }
  0x24   : > { %449 = vperm.xlu1 %697, %v435_v15   ;;  %444 = vperm.xlu0 %696, %v434_v16  }
  0x28   : > { %459 = vperm.xlu1 %697, %v437_v17   ;;  %454 = vperm.xlu0 %696, %v436_v18  }
  0x2c   : > { %469 = vperm.xlu1 %697, %v439_v19   ;;  %464 = vperm.xlu0 %696, %v438_v20  }
  0x30   : > { %479 = vperm.xlu1 %697, %v441_v21   ;;  %474 = vperm.xlu0 %696, %v440_v22  }
  0x93   : > { %v389_v23 = vpop.permute.xlu0 %388  ;;  %v399_v24 = vpop.permute.xlu1 %398 }
  0x97   : > { %v394_v25 = vpop.permute.xlu0 %393  ;;  %v404_v26 = vpop.permute.xlu1 %403 }
  0x9b   : > { %v409_v27 = vpop.permute.xlu0 %408  ;;  %v414_v28 = vpop.permute.xlu1 %413 }
  0x9f   : > { %v419_v29 = vpop.permute.xlu0 %418  ;;  %v424_v30 = vpop.permute.xlu1 %423 }
  0xa3   : > { %v445_v31 = vpop.permute.xlu0 %444  ;;  %v450_v32 = vpop.permute.xlu1 %449 }
  0xa7   : > { %v455_v33 = vpop.permute.xlu0 %454  ;;  %v460_v34 = vpop.permute.xlu1 %459 }
  0xab   : > { %v465_v35 = vpop.permute.xlu0 %464  ;;  %v470_v36 = vpop.permute.xlu1 %469 }
  0xaf   : > { %v475_v37 = vpop.permute.xlu0 %474  ;;  %v480_v60 = vpop.permute.xlu1 %479 }
  0xe9   : > { %v661_v38 = vpop.f32.mrb[0].mxu0  ;;  %v665_v39 = vpop.f32.mrb[0].mxu1 }
  0xea   : > { %v428_v40 = vsub.f32 %v661_v38, %v399_v24  ;;  %v432_v41 = vsub.f32 %v665_v39, %v419_v29  ;;  %v347_v42 = vpop.f32.mrb[1].mxu0  ;;  %v363_v43 = vpop.f32.mrb[1].mxu1 }
  0xeb   : > { %v426_v44 = vsub.f32 %v347_v42, %v389_v23  ;;  %v430_v45 = vsub.f32 %v363_v43, %v409_v27  ;;  %v662_v46 = vpop.f32.mrb[2].mxu0  ;;  %v666_v47 = vpop.f32.mrb[2].mxu1 }
  0xec   : > { %v484_v48 = vmul.f32 %v455_v33, %v428_v40  ;;  %v488_v49 = vmul.f32 %v475_v37, %v432_v41  ;;  %v429_v50 = vsub.f32 %v662_v46, %v404_v26  ;;  %v433_v51 = vsub.f32 %v666_v47, %v424_v30  ;;  %v350_v52 = vpop.f32.mrb[3].mxu0  ;;  %v366_v53 = vpop.f32.mrb[3].mxu1 }
  0xed   : > { %v482_v54 = vmul.f32 %v445_v31, %v426_v44  ;;  %v486_v55 = vmul.f32 %v465_v35, %v430_v45  ;;  %v427_v56 = vsub.f32 %v350_v52, %v394_v25  ;;  %v431_v57 = vsub.f32 %v366_v53, %v414_v28 }
  0xee   : > { %vm492_vm3 = vcmp.ge.f32.partialorder %v484_v48, 0.0  ;;  %v500_v58 = vmul.f32 0.01, %v484_v48  ;;  %vm496_vm4 = vcmp.ge.f32.partialorder %v488_v49, 0.0  ;;  %v504_v59 = vmul.f32 0.01, %v488_v49 }
  0xef   : > { %vm490_vm5 = vcmp.ge.f32.partialorder %v482_v54, 0.0  ;;  %v498_v61 = vmul.f32 0.01, %v482_v54  ;;  %vm494_vm6 = vcmp.ge.f32.partialorder %v486_v55, 0.0  ;;  %v502_v62 = vmul.f32 0.01, %v486_v55 }
  0xf0   : > { %v508_v63 = vsel %vm492_vm3, %v484_v48, %v500_v58  ;;  %v512_v0 = vsel %vm496_vm4, %v488_v49, %v504_v59  ;;  %v485_v1 = vmul.f32 %v460_v34, %v429_v50  ;;  %v489_v2 = vmul.f32 %v480_v60, %v433_v51 }
  0xf1   : > { %517 = vst.msk [vmem:[%s803_s14 + $0x10] sm:$0xff] %vm514_vm2, %v508_v63  ;;  %521 = vst.msk [vmem:[%s803_s14 + $0x30] sm:$0xff] %vm514_vm2, %v512_v0  ;;  %v506_v3 = vsel %vm490_vm5, %v482_v54, %v498_v61  ;;  %v510_v4 = vsel %vm494_vm6, %v486_v55, %v502_v62  ;;  %v483_v5 = vmul.f32 %v450_v32, %v427_v56 }
  0xf2   : > { %v487_v6 = vmul.f32 %v470_v36, %v431_v57  ;;  %515 = vst.msk [vmem:[%s803_s14] sm:$0xff] %vm514_vm2, %v506_v3  ;;  %519 = vst.msk [vmem:[%s803_s14 + $0x20] sm:$0xff] %vm514_vm2, %v510_v4  ;;  %vm493_vm7 = vcmp.ge.f32.partialorder %v485_v1, 0.0  ;;  %v501_v7 = vmul.f32 0.01, %v485_v1  ;;  %vm497_vm8 = vcmp.ge.f32.partialorder %v489_v2, 0.0 }
  0xf3   : > { %v505_v8 = vmul.f32 0.01, %v489_v2  ;;  %vm491_vm9 = vcmp.ge.f32.partialorder %v483_v5, 0.0  ;;  %v499_v9 = vmul.f32 0.01, %v483_v5 }
  0xf4   : > { %vm495_vm10 = vcmp.ge.f32.partialorder %v487_v6, 0.0  ;;  %v503_v10 = vmul.f32 0.01, %v487_v6  ;;  %v509_v11 = vsel %vm493_vm7, %v485_v1, %v501_v7 }
  0xf5   : > { %v513_v12 = vsel %vm497_vm8, %v489_v2, %v505_v8  ;;  %518 = vst.msk [vmem:[%s803_s14 + $0x18] sm:$0xff] %vm514_vm2, %v509_v11  ;;  %v507_v13 = vsel %vm491_vm9, %v483_v5, %v499_v9 }
  0xf6   : > { %522 = vst.msk [vmem:[%s803_s14 + $0x38] sm:$0xff] %vm514_vm2, %v513_v12  ;;  %v511_v14 = vsel %vm495_vm10, %v487_v6, %v503_v10  ;;  %516 = vst.msk [vmem:[%s803_s14 + $0x8] sm:$0xff] %vm514_vm2, %v507_v13 }
  0xf7   : > { %520 = vst.msk [vmem:[%s803_s14 + $0x28] sm:$0xff] %vm514_vm2, %v511_v14 }
  0xf8 PF: > { %s14_s17 = sadd.s32 1, %s724_s17   ;;  %s835_s15 = smov %s720_s16 }
  0xf9   : > { %p11_p5 = scmp.ge.s32.totalorder %s14_s17, 4   ;;  %s836_s16 = smov %s838_s18 }
  0xfb   :  { %13 = sbr.rel (!%p11_p5) target bundleno = 2 (0x2), region = 72 }

</bundles_post_ra>
